<compile_context>
chip_gen: v7x
topology: tpu7x:2x2x1
jax: 0.10.0
libtpu: 0.0.40
codegen_flags: <defaults>
</compile_context>

<pallas_src>
import functools

import jax
import jax.numpy as jnp
from jax.experimental import pallas as pl
from jax.experimental.pallas import tpu as pltpu


def _upsample_kernel(x_ref, r_ref, o_ref, *, sh, sw, k_cols, precision):
    # x_ref: (TR, W), r_ref: (W, sw*W), o_ref: (TR, sh*sw*W)
    if sw == 1:
        y = x_ref[...].astype(o_ref.dtype)
    else:
        y = jnp.dot(
            x_ref[...],
            r_ref[...],
            preferred_element_type=jnp.float32,
            precision=precision,
        ).astype(o_ref.dtype)
    # H-repeat: store the same W-expanded tile into each of the `sh` contiguous lane-column
    # blocks of the output (static offsets -> plain stores, no extra MXU work).
    for p in range(sh):
        o_ref[:, p * k_cols:(p + 1) * k_cols] = y


def _sublane(itemsize: int) -> int:
    # Sublane packing granularity: 8 for 4-byte, 16 for 2-byte (bf16), 32 for 1-byte dtypes.
    return max(8, 32 // itemsize)


def _pick_rows_per_block(rows, in_row_bytes, out_row_bytes, r_bytes, sublane, vmem_budget):
    """Row-block size: ~6 MiB output tiles, multiple of the sublane packing, >= 8 grid steps
    when possible, and double-buffered working set within the VMEM budget."""
    if rows <= sublane:
        return int(rows)  # full-extent block is always legal
    tiles_budget = max(vmem_budget - 2 * r_bytes, 2 * 1024 * 1024)
    tr_budget = max(1, tiles_budget // (2 * (in_row_bytes + out_row_bytes)))
    tr_target = max(1, (6 * 1024 * 1024) // out_row_bytes)      # ~6 MiB output tiles
    tr = min(tr_budget, tr_target)
    # >= 8 grid steps -> real DMA/compute overlap and both v7x TensorCores get >= 3-4 steps.
    tr = min(tr, pl.cdiv(rows, 8))
    tr = max(sublane, (tr // sublane) * sublane)
    return int(min(tr, rows))


def _xla_upsample(x, sh, sw):
    return jnp.repeat(jnp.repeat(x, sh, axis=2), sw, axis=3)


def upsample_nearest(x: jax.Array, scale_h: int, scale_w: int, *, exact: bool = True) -> jax.Array:
    """Nearest-neighbor upsample of NCHW `x` by integer (scale_h, scale_w)."""
    N, C, H, W = x.shape
    sh, sw = int(scale_h), int(scale_w)
    if sh == 1 and sw == 1:
        return x

    k_cols = sw * W                                  # width of the MXU-expanded tile
    if x.dtype not in (jnp.float32, jnp.bfloat16):
        # Integer / other dtypes: MXU expansion path is float-only; XLA repeat is exact.
        return _xla_upsample(x, sh, sw)
    if k_cols < 128:
        # Lane-sparse output (masked partial vst) + lane-starved MXU: XLA does this better.
        return _xla_upsample(x, sh, sw)

    itemsize = jnp.dtype(x.dtype).itemsize
    rows = N * C * H
    out_cols = sh * k_cols

    # Per-generation VMEM budget: v7x has 64 MiB physical (=> ~48 MiB limit), v5e/v6e 128 MiB
    # (=> 96 MiB limit).  v5e's default scoped limit is only 16 MiB, so set it explicitly.
    try:
        vmem_physical = int(pltpu.get_tpu_info().vmem_capacity_bytes)
    except Exception:
        vmem_physical = 64 * 1024 * 1024
    vmem_limit = min(vmem_physical * 3 // 4, 96 * 1024 * 1024)
    vmem_budget = int(vmem_limit * 0.8)              # headroom for Mosaic-internal scratch

    # Expansion matrix footprint.  Its index map is constant so it is DMA'd once, but Pallas
    # still allocates a double buffer for it; budget for 2x.
    # TODO(synk): for very wide W, single-buffer R (pl.Buffered(1) / manual copy) or tile W too.
    r_bytes = W * k_cols * itemsize
    if 2 * r_bytes > vmem_budget // 2:
        return _xla_upsample(x, sh, sw)

    sublane = _sublane(itemsize)
    tr = _pick_rows_per_block(rows, W * itemsize, out_cols * itemsize, r_bytes,
                              sublane, vmem_budget)
    grid = (pl.cdiv(rows, tr),)                      # partial last block handled by Pallas

    # 0/1 expansion matrix for the W-repeat only: output column j = w*sw + q sources column w.
    src_col = jnp.arange(k_cols) // sw
    r_mat = (src_col[None, :] == jnp.arange(W)[:, None]).astype(x.dtype)     # (W, sw*W)

    if x.dtype == jnp.float32:
        # HIGHEST keeps the copy bit-exact.  HIGH (bf16_3x) only covers ~16 mantissa bits,
        # so it is NOT exact for f32; it is offered as an opt-in speed/accuracy trade.
        precision = jax.lax.Precision.HIGHEST if exact else jax.lax.Precision.HIGH
    else:
        precision = jax.lax.Precision.DEFAULT        # bf16 single-pass is already exact here

    x_flat = x.reshape(rows, W)                      # free metadata reshape

    kernel = functools.partial(_upsample_kernel, sh=sh, sw=sw, k_cols=k_cols,
                               precision=precision)

    out_flat = pl.pallas_call(
        kernel,
        out_shape=jax.ShapeDtypeStruct((rows, out_cols), x.dtype),
        grid_spec=pltpu.PrefetchScalarGridSpec(
            num_scalar_prefetch=0,
            grid=grid,
            in_specs=[
                pl.BlockSpec((tr, W), lambda b: (b, 0)),
                # Constant block index -> R is DMA'd once and revisited across all steps.
                pl.BlockSpec((W, k_cols), lambda b: (0, 0)),
            ],
            out_specs=pl.BlockSpec((tr, out_cols), lambda b: (b, 0)),
        ),
        compiler_params=pltpu.CompilerParams(
            dimension_semantics=("parallel",),
            vmem_limit_bytes=int(vmem_limit),
        ),
        cost_estimate=pl.CostEstimate(
            flops=2 * rows * W * k_cols,
            transcendentals=0,
            bytes_accessed=(rows * W + rows * out_cols + W * k_cols) * itemsize,
        ),
    )(x_flat, r_mat)

    # (rows, sh*sw*W) is the same row-major buffer as (N, C, H*sh, W*sw): free reshape.
    return out_flat.reshape(N, C, H * sh, W * sw)


class Upsample:
    """JAX/Pallas equivalent of the PyTorch Upsample module (mode='nearest').

    Only mode='nearest' with positive integer scale factors is implemented.  float32/bfloat16
    inputs run the Pallas kernel; integer dtypes and lane-sparse small-W shapes take an XLA
    `jnp.repeat` fallback with identical semantics.
    """

    def __init__(self, scale_factor, mode: str = "nearest"):
        assert mode == "nearest", "only nearest mode implemented"
        if isinstance(scale_factor, (tuple, list)):
            sh, sw = scale_factor
        else:
            sh = sw = scale_factor
        if float(sh) != int(sh) or float(sw) != int(sw):
            # TODO(synk): non-integer scale factors (floor(dst_idx / scale) gather) not implemented.
            raise NotImplementedError("only integer scale factors are supported")
        self.scale_h, self.scale_w = int(sh), int(sw)
        self.mode = mode

    def __call__(self, x):
        return upsample_nearest(x, self.scale_h, self.scale_w)


if __name__ == "__main__":
    key = jax.random.PRNGKey(0)
    # W chosen so sw*W >= 128: the Pallas path (not the small-W XLA fallback) is exercised.
    N, C, H, W = 2, 4, 16, 64
    scale = 2
    x = jax.random.normal(key, (N, C, H, W), dtype=jnp.float32)

    model = Upsample(scale_factor=scale, mode="nearest")
    out = jax.block_until_ready(jax.jit(model)(x))

    # Reference: nearest upsample with integer scale == repeat along H and W.
    ref = jnp.repeat(jnp.repeat(x, scale, axis=2), scale, axis=3)

    assert out.shape == (N, C, H * scale, W * scale), out.shape
    assert jnp.allclose(out, ref, rtol=1e-6, atol=1e-6), "mismatch vs reference nearest upsample"
    print("KERNEL_OK")
</pallas_src>

<mosaic_0001>
module attributes {stable_mosaic.version = 11 : i64} {
  func.func @_upsample_kernel(%arg0: i32, %arg1: memref<16x64xf32, #tpu.memory_space<vmem>>, %arg2: memref<64x128xf32, #tpu.memory_space<vmem>>, %arg3: memref<16x256xf32, #tpu.memory_space<vmem>>) attributes {dimension_semantics = [#tpu.dimension_semantics<parallel>], iteration_bounds = array<i64: 8>, scalar_prefetch = 0 : i64, scratch_operands = 0 : i64, tpu.core_type = #tpu.core_type<tc>, window_params = [{transform_indices = @transform_0, window_bounds = array<i64: 16, 64>}, {pipeline_mode = #tpu.pipeline_mode<synchronous>, transform_indices = @transform_1, window_bounds = array<i64: 64, 128>}, {transform_indices = @transform_2, window_bounds = array<i64: 16, 256>}]} {
    %c0 = arith.constant 0 : index
    %c0_0 = arith.constant 0 : index
    %0 = vector.load %arg1[%c0, %c0_0] : memref<16x64xf32, #tpu.memory_space<vmem>>, vector<16x64xf32>
    %c0_1 = arith.constant 0 : index
    %c0_2 = arith.constant 0 : index
    %1 = vector.load %arg2[%c0_1, %c0_2] : memref<64x128xf32, #tpu.memory_space<vmem>>, vector<64x128xf32>
    %cst = arith.constant dense<0.000000e+00> : vector<16x128xf32>
    %2 = tpu.matmul %0, %1, %cst {dimension_numbers = #tpu.dot_dimension_numbers<[1], [0], [0], [1], [0, 0, 1, 1], [], []>, precision = #tpu.contract_precision<fp32>} : vector<16x64xf32>, vector<64x128xf32>, vector<16x128xf32> -> vector<16x128xf32>
    %c0_3 = arith.constant 0 : index
    %c0_4 = arith.constant 0 : index
    %3 = vector.load %arg3[%c0_3, %c0_4] : memref<16x256xf32, #tpu.memory_space<vmem>>, vector<16x128xf32>
    tpu.vector_store %arg3[%c0_3, %c0_4], %2 {strides = array<i32>} : memref<16x256xf32, #tpu.memory_space<vmem>>, vector<16x128xf32>,
    %c0_5 = arith.constant 0 : index
    %c128 = arith.constant 128 : index
    %4 = vector.load %arg3[%c0_5, %c128] : memref<16x256xf32, #tpu.memory_space<vmem>>, vector<16x128xf32>
    tpu.vector_store %arg3[%c0_5, %c128], %2 {strides = array<i32>} : memref<16x256xf32, #tpu.memory_space<vmem>>, vector<16x128xf32>,
    return
  }
  func.func @transform_0(%arg0: i32) -> (i32, i32) {
    %c0_i32 = arith.constant 0 : i32
    %c0_i32_0 = arith.constant 0 : i32
    return %arg0, %c0_i32 : i32, i32
  }
  func.func @transform_1(%arg0: i32) -> (i32, i32) {
    %c0_i32 = arith.constant 0 : i32
    %c0_i32_0 = arith.constant 0 : i32
    %c0_i32_1 = arith.constant 0 : i32
    return %c0_i32, %c0_i32_0 : i32, i32
  }
  func.func @transform_2(%arg0: i32) -> (i32, i32) {
    %c0_i32 = arith.constant 0 : i32
    %c0_i32_0 = arith.constant 0 : i32
    return %arg0, %c0_i32 : i32, i32
  }
}

</mosaic_0001>

<bundles_post_ra>
// kernel: _unnamed_function_.1
= control target key start
LH: loop header
LB: loop body
LE: loop exit
PB: predicated region body
PF: predicated region fallthrough
CT: control target
= control target key end

     0   :  { %7 = vsyncpa [#allocation3], 0  ;;  %s1481_s0 = inlined_call_operand.hbm [shape: f32[128,64], index: 0, kind: input, shape index: {}]   ;;  %s1482_s1 = inlined_call_operand.vmem [shape: f32[64,128], index: 1, kind: input, shape index: {}]   ;;  %s1483_s2 = inlined_call_operand.vmem [shape: f32[128,256], index: 2, kind: output, shape index: {}]  }
   0x1   :  { %9 = vsyncpa [#allocation3 + $0x1], 0  ;;  %s1259_s9 = smov 0   ;;  %s1261_s10 = smov 0  }
   0x2   :  { %s1263_s11 = smov 0   ;;  %s1265_s12 = smov 0  }
   0x3 LB: > { %s838_s13 = sadd.s32 4294967295, %s1239_s12   ;;  %s1279_s14 = sadd.s32 1, %s1239_s12   ;;  %s1239_s12 = sphi %s1265_s12, %s1490_s12   ;;  %s1235_s11 = sphi %s1263_s11, %s1489_s11   ;;  %s1231_s10 = sphi %s1261_s10, %s1488_s10   ;;  %s1227_s9 = sphi %s1259_s9, %s1487_s9  }
   0x4   : > { %s19_s15 = ssub.s32 %s1239_s12, %s1279_s14  ;;  %s22_s16 = sadd.s32 1, %s1235_s11 }
   0x5   : > { %p20_p0 = scmp.eq.s32.totalorder %s19_s15, 0  ;;  %p29_p1 = scmp.ne.s32.totalorder %s1235_s11, %s1231_s10 }
   0x6   : > { %p30_p2 = scmp.eq.s32.totalorder %s1239_s12, 0  ;;  %p35_p3 = scmp.ne.s32.totalorder %s1231_s10, %s1227_s9 }
   0x7   : > { %s1289_s17 = scalar_select %p20_p0, %s1235_s11, %s22_s16  }
   0x8   : > { %p31_p4 = por %p30_p2, %p29_p1  ;;  %p36_p5 = scmp.eq.s32.totalorder %s838_s13, 0 }
   0x9   : > { %p1140_p6 = scmp.lt.s32.totalorder %s1239_s12, 8  ;;  %s109_s19 = sand.u32 1, %s1235_s11  }
   0xa   : > { %p1294_p7 = por %p36_p5, %p35_p3  ;;  %s842_s20 = sshll.u32 %s109_s19, 4 }
   0xb   : > { %s852_s21 = sshll.u32 %s1239_s12, 8  ;;  %s113_s25 = scalar_lea.vmem [#allocation2], %s842_s20 }
   0xc   : > { %s1303_s24 = scalar_lea.hbm %s1481_s0, %s852_s21  ;;  %s120_s26 = sshll.u32 %s113_s25, 4  ;;  %s1305_s26 = int_to_ptr.vmem [resolvable:$true] %s120_s26 }
   0xd   : > { %p1307_p8 = pnand %p1140_p6, %p31_p4  ;;  %s1312_s28 = scalar_lea.sflag [#allocation3], %s109_s19 }
   0xe   : > { %s1175_s29 = scalar_lea.hbm %s1303_s24, 256  ;;  %s1180_s4 = scalar_lea.hbm %s1481_s0, 2048 }
   0xf   : > { %p1176_p10 = scmp.ne.s32.totalorder %s1303_s24, %s1175_s29  ;;  %p1177_p11 = pneg %p1307_p8 }
  0x10   : > { %p1181_p0 = scmp.lt.u32.totalorder %s1303_s24, %s1481_s0  ;;  %p1182_p1 = scmp.lt.u32.totalorder %s1180_s4, %s1175_s29 }
  0x11   : > { %p1178_p12 = pnand %p1177_p11, %p1176_p10  ;;  %p1184_p3 = scmp.lt.u32.totalorder %s1175_s29, %s1303_s24 }
  0x12   : > { %p1183_p2 = por %p1182_p1, %p1181_p0 }
  0x13   : > { %p1179_p13 = pneg %p1178_p12 }
  0x14   : > { %p1185_p4 = por %p1184_p3, %p1183_p2 }
  0x16   : > { %p1186_p5 = pnand %p1185_p4, %p1179_p13 }
  0x18   : > { %1189 = shalt.err (!%p1186_p5)
}
  0x19   : > { %s1190_s7 = scalar_lea.vmem %s1305_s26, 256  ;;  %s1241_s8 = smov [#allocation2]  }
  0x1a   : > { %p1191_p6 = scmp.ne.s32.totalorder %s1305_s26, %s1190_s7  ;;  %s1195_s9 = sshll.u32 %s1241_s8, 4  ;;  %s1196_s9 = int_to_ptr.vmem [resolvable:$false] %s1195_s9 }
  0x1b   : > { %s1197_s15 = scalar_lea.vmem %s1196_s9, 512  ;;  %p1198_p9 = scmp.lt.s32.totalorder %s1305_s26, %s1196_s9 }
  0x1c   : > { %p1193_p10 = pnand %p1191_p6, %p1177_p11  ;;  %p1199_p0 = scmp.lt.s32.totalorder %s1197_s15, %s1190_s7 }
  0x1e   : > { %p1194_p12 = pneg %p1193_p10  ;;  %p1200_p1 = por %p1199_p0, %p1198_p9 }
  0x20   : > { %p1201_p2 = pnand %p1200_p1, %p1194_p12 }
  0x22   : > { %1204 = shalt.err (!%p1201_p2)
}
  0x23   : > { %s1242_s16 = smov 128   ;;  %s1243_s19 = smov 8  }
  0x24   : > { %1139 = dma.hbm_to_vmem [thread:$0]  (!%p1307_p8), %s1303_s24, 256, %s1305_s26, %s1312_s28, %s1242_s16, %s1242_s16, %s1243_s19  }
  0x25   : > { %p128_p11 = scmp.lt.s32.totalorder %s1239_s12, 9  ;;  %p1486_p13 = scmp.ge.s32.totalorder %s1239_s12, 1 }
  0x27   : > { %p129_p3 = pnand %p1486_p13, %p128_p11 }
  0x28   : > { %s134_s20 = sand.u32 (!%p129_p3), 1, %s1231_s10  }
  0x29   : > { %132 = sbr.rel (%p129_p3) target bundleno = 318 (0x13e), region = 28  ;;  %s846_s21 = sshll.u32 (!%p129_p3), %s134_s20, 4 }
  0x2a   : > { %s135_s22 = scalar_lea.sflag (!%p129_p3), [#allocation3], %s134_s20  ;;  %s138_s23 = scalar_lea.vmem (!%p129_p3), [#allocation2], %s846_s21 }
  0x30   : > { %1222 = dma.done.wait (%p1294_p7), %s135_s22, 256  }
  0x31   : > { %1224 = vsyncadd (%p1294_p7), %s135_s22, 4294967040  ;;  %v170_v0 = vld [vmem:[%s1482_s1] sm:$0xff]  ;;  %v171_v1 = vld [vmem:[%s1482_s1 + $0x8] sm:$0xff]  ;;  %vm178_vm0 = vcmask 523264   ;;  %s847_s16 = sshll.u32 %s838_s13, 1 }
  0x32   : > { %v172_v2 = vld [vmem:[%s1482_s1 + $0x10] sm:$0xff]  ;;  %v186_v3 = vand.u32 4294901760, %v170_v0  ;;  %v189_v4 = vand.u32 4294901760, %v171_v1  ;;  %v173_v5 = vld [vmem:[%s1482_s1 + $0x18] sm:$0xff]  ;;  %v174_v7 = vld [vmem:[%s1482_s1 + $0x20] sm:$0xff]  ;;  %p162_p7 = scmp.lt.s32.totalorder %s847_s16, 15 }
  0x33   : > { %v192_v6 = vand.u32 4294901760, %v172_v2  ;;  %v175_v8 = vld [vmem:[%s1482_s1 + $0x28] sm:$0xff]  ;;  %v195_v9 = vand.u32 4294901760, %v173_v5  ;;  %v198_v10 = vand.u32 4294901760, %v174_v7  ;;  %v176_v12 = vld [vmem:[%s1482_s1 + $0x30] sm:$0xff]  ;;  %v177_v15 = vld [vmem:[%s1482_s1 + $0x38] sm:$0xff] }
  0x34   : > { %v201_v11 = vand.u32 4294901760, %v175_v8  ;;  %v168_v13 = vld [vmem:[%s138_s23] sm:$0xff]  ;;  %v1369_v14 = vpack.c.bf16 %v189_v4, %v186_v3  ;;  %v169_v16 = vld [vmem:[%s138_s23 + $0x8] sm:$0xff]  ;;  %v204_v19 = vand.u32 4294901760, %v176_v12  ;;  %v1386_v24 = vsub.f32 %v170_v0, %v186_v3  ;;  %s1492_s16 = smov (!%p162_p7, %s847_s16), 15 }
  0x35   : > { %v180_v17 = vsel %vm178_vm0, %v168_v13, 0  ;;  %v1375_v18 = vpack.c.bf16 %v195_v9, %v192_v6  ;;  %v183_v20 = vsel %vm178_vm0, %v169_v16, 0  ;;  %v1388_v25 = vsub.f32 %v171_v1, %v189_v4  ;;  %s853_s19 = sshll.u32 %s1492_s16, 4 }
  0x36   : > { %v1378_v21 = vand.u32 4294901760, %v180_v17  ;;  %1029 = vmatprep.subr.bf16.mxu1 %v1369_v14  ;;  %1077 = vmatprep.subr.bf16.mxu0 %v1369_v14  ;;  %v1382_v22 = vpack.c.bf16 %v201_v11, %v198_v10  ;;  %v1384_v23 = vand.u32 4294901760, %v183_v20  ;;  %v207_v26 = vand.u32 4294901760, %v177_v15  ;;  %s166_s22 = scalar_lea.vmem %s1483_s2, %s853_s19 }
  0x37   : > { %1031 = vmatpush3.bf16.msra.mxu1 %v1369_v14  ;;  %1079 = vmatpush3.bf16.msra.mxu0 %v1369_v14  ;;  %v1395_v28 = vsub.f32 %v172_v2, %v192_v6  ;;  %v1397_v29 = vsub.f32 %v173_v5, %v195_v9  ;;  %v281_v30 = vand.u32 4294901760, %v1386_v24  ;;  %v288_v31 = vand.u32 4294901760, %v1388_v25 }
  0x38   : > { %v1393_v27 = vsub.f32 %v180_v17, %v1378_v21  ;;  %1033 = vmatprep.subr.bf16.mxu1 %v1375_v18  ;;  %1081 = vmatprep.subr.bf16.mxu0 %v1375_v18  ;;  %v1404_v32 = vsub.f32 %v183_v20, %v1384_v23  ;;  %v1406_v33 = vsub.f32 %v174_v7, %v198_v10 }
  0x39   : > { %v295_v35 = vand.u32 4294901760, %v1395_v28  ;;  %v302_v36 = vand.u32 4294901760, %v1397_v29  ;;  %v282_v37 = vsub.f32 %v1386_v24, %v281_v30  ;;  %v289_v38 = vsub.f32 %v1388_v25, %v288_v31 }
  0x3a   : > { %v260_v34 = vand.u32 4294901760, %v1393_v27  ;;  %v270_v39 = vand.u32 4294901760, %v1404_v32  ;;  %v1414_v40 = vsub.f32 %v175_v8, %v201_v11  ;;  %v1423_v44 = vpack.c.bf16 %v207_v26, %v204_v19 }
  0x3b   : > { %1035 = vmatpush3.bf16.msra.mxu1 %v1375_v18  ;;  %1083 = vmatpush3.bf16.msra.mxu0 %v1375_v18  ;;  %v296_v42 = vsub.f32 %v1395_v28, %v295_v35  ;;  %v303_v43 = vsub.f32 %v1397_v29, %v302_v36  ;;  %v283_v45 = vand.u32 4294901760, %v282_v37  ;;  %v290_v46 = vand.u32 4294901760, %v289_v38 }
  0x3c   : > { %v261_v41 = vsub.f32 %v1393_v27, %v260_v34  ;;  %1037 = vmatprep.subr.bf16.mxu1 %v1382_v22  ;;  %1085 = vmatprep.subr.bf16.mxu0 %v1382_v22  ;;  %v309_v47 = vand.u32 4294901760, %v1406_v33  ;;  %v271_v49 = vsub.f32 %v1404_v32, %v270_v39  ;;  %v316_v50 = vand.u32 4294901760, %v1414_v40 }
  0x3d   : > { %987 = vmatprep.mubr.f32.mxu0 %v260_v34  ;;  %v1428_v51 = vsub.f32 %v176_v12, %v204_v19  ;;  %v1092_v52 = vpack.c.bf16 %v288_v31, %v281_v30  ;;  %v297_v53 = vand.u32 4294901760, %v296_v42  ;;  %v304_v54 = vand.u32 4294901760, %v303_v43 }
  0x3e   : > { %v262_v48 = vand.u32 4294901760, %v261_v41  ;;  %v329_v55 = vsub.f32 %v177_v15, %v207_v26  ;;  %v1044_v56 = vpack.c.bf16 %v290_v46, %v283_v45  ;;  %v310_v57 = vsub.f32 %v1406_v33, %v309_v47 }
  0x3f   : > { %1039 = vmatpush3.bf16.msra.mxu1 %v1382_v22  ;;  %1087 = vmatpush3.bf16.msra.mxu0 %v1382_v22  ;;  %v317_v58 = vsub.f32 %v1414_v40, %v316_v50  ;;  %v323_v59 = vand.u32 4294901760, %v1428_v51  ;;  %v272_v61 = vand.u32 4294901760, %v271_v49  ;;  %v1048_v62 = vpack.c.bf16 %v304_v54, %v297_v53 }
  0x40   : > { %1041 = vmatprep.subr.bf16.mxu1 %v1423_v44  ;;  %1089 = vmatprep.subr.bf16.mxu0 %v1423_v44  ;;  %v330_v60 = vand.u32 4294901760, %v329_v55  ;;  %v1096_v63 = vpack.c.bf16 %v302_v36, %v295_v35  ;;  %v311_v0 = vand.u32 4294901760, %v310_v57  ;;  %v1100_v5 = vpack.c.bf16 %v316_v50, %v309_v47 }
  0x41   : > { %930 = vmatprep.mubr.f32.mxu1 %v262_v48  ;;  %v318_v1 = vand.u32 4294901760, %v317_v58  ;;  %v324_v2 = vsub.f32 %v1428_v51, %v323_v59  ;;  %v1060_v10 = vpack.c.bf16 %v1388_v25, %v1386_v24  ;;  %v1064_v11 = vpack.c.bf16 %v1397_v29, %v1395_v28 }
  0x42   : > { %v331_v3 = vsub.f32 %v329_v55, %v330_v60  ;;  %v1104_v9 = vpack.c.bf16 %v330_v60, %v323_v59  ;;  %v1068_v12 = vpack.c.bf16 %v1414_v40, %v1406_v33  ;;  %v1072_v13 = vpack.c.bf16 %v329_v55, %v1428_v51 }
  0x43   : > { %1043 = vmatpush3.bf16.msra.mxu1 %v1423_v44  ;;  %1091 = vmatpush3.bf16.msra.mxu0 %v1423_v44  ;;  %v1052_v4 = vpack.c.bf16 %v318_v1, %v311_v0  ;;  %v325_v6 = vand.u32 4294901760, %v324_v2 }
  0x44   : > { %1045 = vmatprep.subr.bf16.mxu1 %v1044_v56  ;;  %1093 = vmatprep.subr.bf16.mxu0 %v1092_v52  ;;  %v332_v7 = vand.u32 4294901760, %v331_v3 }
  0x46   : > { %931 = vmatmul.mubr.f32.vlgmr.msra.gmra.mrb[0].mxu1 %v272_v61  ;;  %988 = vmatmul.mubr.f32.vlgmr.msra.gmra.mrb[0].mxu0 %v270_v39  ;;  %v1056_v8 = vpack.c.bf16 %v332_v7, %v325_v6 }
  0x47   : > { %1047 = vmatpush3.bf16.msra.mxu1 %v1044_v56  ;;  %1095 = vmatpush3.bf16.msra.mxu0 %v1092_v52 }
  0x48   : > { %1049 = vmatprep.subr.bf16.mxu1 %v1048_v62  ;;  %1097 = vmatprep.subr.bf16.mxu0 %v1096_v63 }
  0x49   : > { %949 = vmatprep.mubr.f32.mxu1 %v1378_v21  ;;  %1006 = vmatprep.mubr.f32.mxu0 %v1378_v21 }
  0x4b   : > { %1051 = vmatpush3.bf16.msra.mxu1 %v1048_v62  ;;  %1099 = vmatpush3.bf16.msra.mxu0 %v1096_v63 }
  0x4c   : > { %1053 = vmatprep.subr.bf16.mxu1 %v1052_v4  ;;  %1101 = vmatprep.subr.bf16.mxu0 %v1100_v5 }
  0x4f   : > { %1055 = vmatpush3.bf16.msra.mxu1 %v1052_v4  ;;  %1103 = vmatpush3.bf16.msra.mxu0 %v1100_v5 }
  0x50   : > { %1057 = vmatprep.subr.bf16.mxu1 %v1056_v8  ;;  %1105 = vmatprep.subr.bf16.mxu0 %v1104_v9 }
  0x53   : > { %1059 = vmatpush3.bf16.msra.mxu1 %v1056_v8  ;;  %1107 = vmatpush3.bf16.msra.mxu0 %v1104_v9 }
  0x54   : > { %1061 = vmatprep.subr.bf16.mxu1 %v1060_v10  ;;  %1109 = vmatprep.subr.bf16.mxu0 %v1369_v14 }
  0x56   : > { %950 = vmatmul.mubr.f32.vlgmr.msra.gmra.mrb[0].mxu1 %v1384_v23  ;;  %1007 = vmatmul.mubr.f32.vlgmr.msra.gmra.mrb[0].mxu0 %v1384_v23 }
  0x57   : > { %1063 = vmatpush3.bf16.msra.mxu1 %v1060_v10  ;;  %1111 = vmatpush3.bf16.msra.mxu0 %v1369_v14 }
  0x58   : > { %1065 = vmatprep.subr.bf16.mxu1 %v1064_v11  ;;  %1113 = vmatprep.subr.bf16.mxu0 %v1375_v18 }
  0x59   : > { %968 = vmatprep.mubr.f32.mxu1 %v1393_v27  ;;  %1025 = vmatprep.mubr.f32.mxu0 %v1378_v21 }
  0x5b   : > { %1067 = vmatpush3.bf16.msra.mxu1 %v1064_v11  ;;  %1115 = vmatpush3.bf16.msra.mxu0 %v1375_v18 }
  0x5c   : > { %1069 = vmatprep.subr.bf16.mxu1 %v1068_v12  ;;  %1117 = vmatprep.subr.bf16.mxu0 %v1382_v22 }
  0x5f   : > { %1071 = vmatpush3.bf16.msra.mxu1 %v1068_v12  ;;  %1119 = vmatpush3.bf16.msra.mxu0 %v1382_v22 }
  0x60   : > { %1073 = vmatprep.subr.bf16.mxu1 %v1072_v13  ;;  %1121 = vmatprep.subr.bf16.mxu0 %v1423_v44 }
  0x63   : > { %1075 = vmatpush3.bf16.msra.mxu1 %v1072_v13  ;;  %1123 = vmatpush3.bf16.msra.mxu0 %v1423_v44 }
  0x66   : > { %969 = vmatmul.mubr.f32.vlgmr.msra.gmra.mrb[0].mxu1 %v1404_v32  ;;  %1026 = vmatmul.mubr.f32.vlgmr.msra.gmra.mrb[0].mxu0 %v1384_v23 }
 0x139   : > { %v970_v14 = vpop.f32.mrb[0].mxu1  ;;  %v1027_v15 = vpop.f32.mrb[0].mxu0 }
 0x13a   : > { %v1124_v16 = vadd.f32 %v1027_v15, %v970_v14  ;;  %v479_v17 = vpop.f32.mrb[1].mxu1  ;;  %v755_v18 = vpop.f32.mrb[1].mxu0 }
 0x13b   : > { %v1125_v19 = vadd.f32 %v755_v18, %v479_v17 }
 0x13c   : > { %766 = vst [vmem:[%s166_s22 + $0x10] sm:$0xff] %v1124_v16  ;;  %768 = vst [vmem:[%s166_s22 + $0x18] sm:$0xff] %v1124_v16 }
 0x13d   : > { %765 = vst [vmem:[%s166_s22] sm:$0xff] %v1125_v19  ;;  %767 = vst [vmem:[%s166_s22 + $0x8] sm:$0xff] %v1125_v19 }
 0x13e PF: > { %p12_p8 = scmp.ge.s32.totalorder %s1279_s14, 10   ;;  %s1487_s9 = smov %s1231_s10 }
 0x13f   : > { %s1488_s10 = smov %s1235_s11  ;;  %s1489_s11 = smov %s1289_s17 }
 0x140   : > { %s1490_s12 = smov %s1279_s14  ;;  %14 = sbr.rel (!%p12_p8) target bundleno = 3 (0x3), region = 68 }
 0x147   :  { %793 = vsyncpa [#allocation3], 1 }
 0x148   :  { %795 = vsyncpa [#allocation3 + $0x1], 1 }

</bundles_post_ra>
